<compile_context>
chip_gen: v7x
topology: tpu7x:2x2x1
jax: 0.10.0
libtpu: 0.0.40
codegen_flags: <defaults>
</compile_context>

<pallas_src>
from functools import partial, lru_cache

import jax
import jax.numpy as jnp
from jax.experimental import pallas as pl
from jax.experimental.pallas import tpu as pltpu


@lru_cache(maxsize=None)
def _roll_sign():
    """Probe pltpu.roll's rotation direction once (robust across jax versions).

    Returns +1 if pltpu.roll matches jnp.roll (result[i] = x[(i - shift) % n]),
    -1 if the direction is inverted.
    """
    def probe(x_ref, o_ref):
        o_ref[...] = pltpu.roll(x_ref[...], 3, 1)

    x = jnp.arange(8 * 256, dtype=jnp.float32).reshape(8, 256)
    y = pl.pallas_call(probe, out_shape=jax.ShapeDtypeStruct((8, 256), jnp.float32))(x)
    return 1 if bool(jnp.array_equal(y, jnp.roll(x, 3, axis=1))) else -1


def _dwpw_kernel(x_ref, row_ref, col_ref, dww_ref, dwb_ref, pwwT_ref, pwb_ref,
                 o_ref, *, K, H, W, pad, roll_sign):
    # x_ref   : (1, Cin, H*W)  one batch element, spatial flattened on the lane axis
    # row_ref : (1, H*W) i32   row index of each flattened position
    # col_ref : (1, H*W) i32   col index of each flattened position
    # dww_ref : (K*K, Cin, 1)  depthwise weights, tap-major
    # dwb_ref : (Cin, 1)       depthwise bias
    # pwwT_ref: (Cout, Cin)    pointwise weights (pre-transposed)
    # pwb_ref : (Cout, 1)      pointwise bias
    # o_ref   : (1, Cout, H*W) stride-1 "full grid" output (lane-dense store)
    HW = H * W
    x = x_ref[0]                                   # (Cin, HW), original dtype
    row = row_ref[...]                             # (1, HW) int32
    col = col_ref[...]                             # (1, HW) int32

    acc = jnp.zeros(x.shape, jnp.float32)          # f32 accumulator, (Cin, HW)
    for kh in range(K):                            # static K*K tap unroll
        for kw in range(K):
            t = kh * K + kw
            dh, dw = kh - pad, kw - pad
            d = dh * W + dw                        # flat shift of this tap
            shifted = x if d == 0 else pltpu.roll(x, (roll_sign * -d) % HW, 1)
            # Mask taps that would read across the (implicit) zero padding or
            # wrap across image rows -- this replaces a padded buffer.
            valid = ((row + dh >= 0) & (row + dh < H) &
                     (col + dw >= 0) & (col + dw < W))          # (1, HW)
            tap_w = dww_ref[t].astype(jnp.float32) * valid.astype(jnp.float32)
            acc = acc + shifted.astype(jnp.float32) * tap_w      # VPU FMA
    acc = acc + dwb_ref[...].astype(jnp.float32)                 # (Cin,1) bcast

    # Pointwise 1x1 conv: (Cout, Cin) @ (Cin, H*W) -- lane-dense MXU matmul.
    y = jnp.dot(pwwT_ref[...].astype(jnp.float32), acc,
                preferred_element_type=jnp.float32)              # (Cout, HW)
    y = y + pwb_ref[...].astype(jnp.float32)
    o_ref[0] = y.astype(o_ref.dtype)                             # full unmasked store


def depthwise_conv2d(x_nchw, dw_w, dw_b, pw_w, pw_b, *, kernel_size, padding=0, stride=1):
    """x_nchw: (N, Cin, H, W); dw_w: (K, K, Cin); dw_b: (Cin,);
    pw_w: (Cin, Cout); pw_b: (Cout,). Returns (N, Cout, Ho, Wo)."""
    N, Cin, H, W = x_nchw.shape
    K = kernel_size
    Cout = pw_w.shape[1]
    if 2 * padding > K - 1:
        # TODO(synk): support over-padded configs (output grid larger than input grid).
        raise NotImplementedError("padding > (kernel_size - 1) // 2 is not supported")
    Ho = (H + 2 * padding - K) // stride + 1
    Wo = (W + 2 * padding - K) // stride + 1
    HW = H * W

    # Free contiguous reshapes + tiny weight prep (no HBM pass over activations).
    x_flat = x_nchw.reshape(N, Cin, HW)
    dww = dw_w.reshape(K * K, Cin)[:, :, None]          # (K*K, Cin, 1)
    dwb = dw_b.reshape(Cin, 1)
    pwwT = jnp.transpose(pw_w)                          # (Cout, Cin)
    pwb = pw_b.reshape(Cout, 1)
    row = jnp.repeat(jnp.arange(H, dtype=jnp.int32), W).reshape(1, HW)
    col = jnp.tile(jnp.arange(W, dtype=jnp.int32), H).reshape(1, HW)

    kernel = partial(_dwpw_kernel, K=K, H=H, W=W, pad=padding,
                     roll_sign=_roll_sign())

    out_flat = pl.pallas_call(
        kernel,
        out_shape=jax.ShapeDtypeStruct((N, Cout, HW), x_nchw.dtype),
        grid_spec=pltpu.PrefetchScalarGridSpec(
            num_scalar_prefetch=0,
            grid=(N,),
            in_specs=[
                pl.BlockSpec((1, Cin, HW), lambda n: (n, 0, 0)),
                pl.BlockSpec((1, HW), lambda n: (0, 0)),
                pl.BlockSpec((1, HW), lambda n: (0, 0)),
                pl.BlockSpec((K * K, Cin, 1), lambda n: (0, 0, 0)),
                pl.BlockSpec((Cin, 1), lambda n: (0, 0)),
                pl.BlockSpec((Cout, Cin), lambda n: (0, 0)),
                pl.BlockSpec((Cout, 1), lambda n: (0, 0)),
            ],
            out_specs=pl.BlockSpec((1, Cout, HW), lambda n: (n, 0, 0)),
        ),
        compiler_params=pltpu.CompilerParams(dimension_semantics=("parallel",)),
    )(x_flat, row, col, dww, dwb, pwwT, pwb)

    out = out_flat.reshape(N, Cout, H, W)               # free reshape back to NCHW
    if stride != 1 or Ho != H or Wo != W:
        # TODO(synk): fold the stride subsample / valid-crop of the stride-1
        # full-grid result into the kernel's output stage.
        out = out[:, :, ::stride, ::stride][:, :, :Ho, :Wo]
    return out


def _reference(x_nchw, dw_w, dw_b, pw_w, pw_b, *, kernel_size, padding, stride):
    """Pure-JAX reference matching nn.Conv2d semantics (NCHW)."""
    Cin = x_nchw.shape[1]
    Cout = pw_w.shape[1]
    w_dw = jnp.transpose(dw_w, (2, 0, 1))[:, None, :, :]          # (Cin,1,K,K)
    y = jax.lax.conv_general_dilated(
        x_nchw, w_dw, (stride, stride),
        ((padding, padding), (padding, padding)),
        feature_group_count=Cin,
        dimension_numbers=("NCHW", "OIHW", "NCHW"))
    y = y + dw_b.reshape(1, Cin, 1, 1)
    w_pw = jnp.transpose(pw_w, (1, 0))[:, :, None, None]          # (Cout,Cin,1,1)
    z = jax.lax.conv_general_dilated(
        y, w_pw, (1, 1), ((0, 0), (0, 0)),
        dimension_numbers=("NCHW", "OIHW", "NCHW"))
    return z + pw_b.reshape(1, Cout, 1, 1)


if __name__ == "__main__":
    # DepthWiseConv2d(dim_in=4, dim_out=8, kernel_size=3, ...)
    N, Cin, H, W = 2, 4, 16, 16
    Cout, K = 8, 3

    key = jax.random.PRNGKey(0)
    k1, k2, k3, k4, k5 = jax.random.split(key, 5)
    x = jax.random.normal(k1, (N, Cin, H, W), jnp.float32)
    dw_w = jax.random.normal(k2, (K, K, Cin), jnp.float32) * 0.2   # depthwise (K,K,Cin)
    dw_b = jax.random.normal(k3, (Cin,), jnp.float32) * 0.1
    pw_w = jax.random.normal(k4, (Cin, Cout), jnp.float32) * 0.2   # pointwise (Cin,Cout)
    pw_b = jax.random.normal(k5, (Cout,), jnp.float32) * 0.1

    # Exercise the 'same' conv, a strided conv, and a valid (padding=0) conv.
    for padding, stride in ((1, 1), (1, 2), (0, 1)):
        out = depthwise_conv2d(x, dw_w, dw_b, pw_w, pw_b,
                               kernel_size=K, padding=padding, stride=stride)
        out = jax.block_until_ready(out)
        ref = _reference(x, dw_w, dw_b, pw_w, pw_b,
                         kernel_size=K, padding=padding, stride=stride)
        assert out.shape == ref.shape, (padding, stride, out.shape, ref.shape)
        err = float(jnp.abs(out - ref).max())
        assert jnp.allclose(out, ref, atol=1e-4, rtol=1e-4), (padding, stride, err)

    print("KERNEL_OK")
</pallas_src>

<mosaic_0001>
module attributes {stable_mosaic.version = 11 : i64} {
  func.func @probe(%arg0: memref<8x256xf32, #tpu.memory_space<vmem>>, %arg1: memref<8x256xf32, #tpu.memory_space<vmem>>) attributes {dimension_semantics = [], scalar_prefetch = 0 : i64, scratch_operands = 0 : i64, tpu.core_type = #tpu.core_type<tc>} {
    %c0 = arith.constant 0 : index
    %c0_0 = arith.constant 0 : index
    %0 = vector.load %arg0[%c0, %c0_0] : memref<8x256xf32, #tpu.memory_space<vmem>>, vector<8x256xf32>
    %c3_i32 = arith.constant 3 : i32
    %1 = tpu.dynamic_rotate %0 by %c3_i32 dim 1 : vector<8x256xf32>, i32 -> vector<8x256xf32>
    %c0_1 = arith.constant 0 : index
    %c0_2 = arith.constant 0 : index
    %2 = vector.load %arg1[%c0_1, %c0_2] : memref<8x256xf32, #tpu.memory_space<vmem>>, vector<8x256xf32>
    tpu.vector_store %arg1[%c0_1, %c0_2], %1 {strides = array<i32>} : memref<8x256xf32, #tpu.memory_space<vmem>>, vector<8x256xf32>,
    return
  }
}

</mosaic_0001>

<bundles_post_ra>
// kernel: tpu_custom_call.1
= control target key start
LH: loop header
LB: loop body
LE: loop exit
PB: predicated region body
PF: predicated region fallthrough
CT: control target
= control target key end

     0   :  { %6 = vsyncpa [#allocation3], 0  ;;  %s137_s0 = inlined_call_operand.hbm [shape: f32[8,256], index: 0, kind: input, shape index: {}]   ;;  %s138_s1 = inlined_call_operand.hbm [shape: f32[8,256], index: 1, kind: output, shape index: {}]  }
   0x1   :  { %7 = vsyncpa [#allocation4], 0  ;;  %s100_s6 = smov [#allocation2]   ;;  %s52_s10 = scalar_lea.hbm %s137_s0, 256 }
   0x2   :  { %s14_s7 = sshll.u32 %s100_s6, 4  ;;  %p53_p0 = scmp.ne.s32.totalorder %s137_s0, %s52_s10  ;;  %s15_s7 = int_to_ptr.vmem [resolvable:$true] %s14_s7 }
   0x3   :  { %p56_p1 = scmp.lt.u32.totalorder %s52_s10, %s137_s0 }
   0x5   :  { %p58_p2 = pnand %p56_p1, %p53_p0 }
   0x7   :  { %61 = shalt.err (!%p58_p2)
}
   0x8   :  { %s62_s15 = scalar_lea.vmem %s15_s7, 256  ;;  %p67_p4 = scmp.lt.s32.totalorder %s15_s7, %s15_s7 }
   0x9   :  { %p63_p3 = scmp.ne.s32.totalorder %s15_s7, %s62_s15  ;;  %p68_p5 = scmp.lt.s32.totalorder %s62_s15, %s62_s15 }
   0xb   :  { %p69_p6 = por %p68_p5, %p67_p4 }
   0xd   :  { %p70_p7 = pnand %p69_p6, %p63_p3 }
   0xf   :  { %73 = shalt.err (!%p70_p7)
}
  0x10   :  { %17 = dma.hbm_to_vmem [thread:$0]  %s137_s0, 256, %s15_s7, [#allocation3]  }
  0x11   :  { %96 = dma.done.wait [#allocation3], 256  }
  0x12   :  { %97 = vsyncadd [#allocation3], 4294967040  ;;  %v21_v0 = vld [vmem:[#allocation2] sm:$0xff]  ;;  %s101_s18 = smov 3   ;;  %v22_v1 = vld [vmem:[#allocation2 + $0x8] sm:$0xff]  ;;  %v27_v2 = vlaneseq  ;;  %s102_s19 = smov [#allocation5]  }
  0x13   :  { %23 = vrot.lane.b32.xlu0 %v21_v0, %s101_s18  ;;  %s40_s20 = sshll.u32 %s102_s19, 4  ;;  %s41_s20 = int_to_ptr.vmem [resolvable:$true] %s40_s20 }
  0x14   :  { %v28_v3 = vand.u32 127, %v27_v2  ;;  %s74_s0 = scalar_lea.vmem %s41_s20, 256  ;;  %p79_p9 = scmp.lt.s32.totalorder %s41_s20, %s41_s20 }
  0x15   :  { %p75_p8 = scmp.ne.s32.totalorder %s41_s20, %s74_s0  ;;  %p80_p10 = scmp.lt.s32.totalorder %s74_s0, %s74_s0 }
  0x16   :  { %vm29_vm0 = vcmp.lt.s32.totalorder %v28_v3, 3 }
  0x17   :  { %25 = vrot.lane.b32.xlu0 %v22_v1, %s101_s18  ;;  %p81_p11 = por %p80_p10, %p79_p9 }
  0x19   :  { %p82_p12 = pnand %p81_p11, %p75_p8 }
  0x85   :  { %v24_v4 = vpop.permute.xlu0 %23 }
  0x89   :  { %v26_v5 = vpop.permute.xlu0 %25 }
  0x8a   :  { %v30_v6 = vsel %vm29_vm0, %v24_v4, %v26_v5  ;;  %v31_v7 = vsel %vm29_vm0, %v26_v5, %v24_v4 }
  0x8b   :  { %32 = vst [vmem:[#allocation5] sm:$0xff] %v31_v7  ;;  %33 = vst [vmem:[#allocation5 + $0x8] sm:$0xff] %v30_v6 }
  0x8c   :  { %85 = shalt.err (!%p82_p12)
}
  0x8d   :  { %s86_s23 = scalar_lea.hbm %s138_s1, 256 }
  0x8e   :  { %p87_p13 = scmp.ne.s32.totalorder %s138_s1, %s86_s23  ;;  %p90_p0 = scmp.lt.u32.totalorder %s86_s23, %s138_s1 }
  0x90   :  { %p92_p1 = pnand %p90_p0, %p87_p13 }
  0x92   :  { %95 = shalt.err (!%p92_p1)
}
  0x93   :  { %43 = dma.vmem_to_hbm [thread:$0]  %s41_s20, 256, %s138_s1, [#allocation4]  }
  0x94   :  { %98 = dma.done.wait [#allocation4], 256  }
  0x95   :  { %99 = vsyncadd [#allocation4], 4294967040 }
  0x96   :  { %47 = vsyncpa [#allocation3], 1 }
  0x97   :  { %48 = vsyncpa [#allocation4], 1 }

</bundles_post_ra>
